<compile_context>
chip_gen: v7x
topology: tpu7x:2x2x1
jax: 0.10.0
libtpu: 0.0.40
codegen_flags: <defaults>
</compile_context>

<pallas_src>
import jax
import jax.numpy as jnp
import numpy as np
from jax.experimental import pallas as pl
from jax.experimental.pallas import tpu as pltpu


# ----------------------------------------------------------------------------
# Kernel
# ----------------------------------------------------------------------------
def transition_kernel(x_ref, scale_ref, shift_ref, pool_ref, w_ref, o_ref):
    """One (batch block, output-row block) grid step.

    x_ref:     (nb, Cin, S_in)   S_in = tro*2*W, flattened input rows (lane-dense)
    scale_ref: (Cin, 1)          gamma / sqrt(running_var + eps)
    shift_ref: (Cin, 1)          beta - running_mean * scale
    pool_ref:  (S_in, S_out)     block-diagonal 2x2 avg-pool matrix, S_out = tro*Wo
    w_ref:     (Cout, Cin)       1x1 conv weight
    o_ref:     (nb, Cout, S_out) flattened output rows (lane-dense)
    """
    scale = scale_ref[...]          # hoisted: loaded once per grid step
    shift = shift_ref[...]
    pool = pool_ref[...]
    w = w_ref[...]

    nb = x_ref.shape[0]             # static, small (whole images per step)
    for b in range(nb):
        # BN + ReLU on the whole lane-dense block (VPU, f32).
        y = jnp.maximum(x_ref[b] * scale + shift, 0.0)                   # (Cin, S_in)
        # 2x2 avg-pool of every row pair as ONE MXU matmul (pool commutes with
        # the bias-free 1x1 conv, so pooling first sees 4x less data in conv).
        pooled = jnp.dot(y, pool, preferred_element_type=jnp.float32)    # (Cin, S_out)
        # 1x1 conv as ONE MXU matmul over channels.
        out = jnp.dot(w, pooled, preferred_element_type=jnp.float32)     # (Cout, S_out)
        # Single lane-dense store of the whole per-image result.
        o_ref[b] = out.astype(o_ref.dtype)


# ----------------------------------------------------------------------------
# Helpers
# ----------------------------------------------------------------------------
def _build_pool_matrix(W, tro):
    """(tro*2W, tro*Wo) block-diagonal matrix: column (r, wo) averages the 2x2
    window of output row r / output column wo from the flattened row block."""
    Wo = W // 2
    P = np.zeros((tro * 2 * W, tro * Wo), np.float32)
    for r in range(tro):
        for wo in range(Wo):
            col = r * Wo + wo
            for dr in range(2):
                for dw in range(2):
                    P[(2 * r + dr) * W + 2 * wo + dw, col] = 0.25
    return jnp.asarray(P)


def _divisors(n):
    return [d for d in range(1, n + 1) if n % d == 0]


def _pick_blocks(N, Cin, H, W, target_bytes=8 << 20, max_pool_lanes=2048):
    """Pick (nb images, tro output rows) per grid step.

    tro must divide Ho and — unless it covers the whole image — keep both the
    input lane extent (tro*2W) and output lane extent (tro*Wo) multiples of
    128 (Pallas last-dim tiling rule).  Prefer lane extents that keep the
    dense pool matrix / extra MXU work small, then the largest block under the
    byte target.  If a whole image fits, batch nb images per step, but keep at
    least 2 grid steps so the second TensorCore is not idle.
    """
    Ho, Wo = H // 2, W // 2
    row_bytes = Cin * 2 * W * 4        # f32 input bytes per output row
    cands = [t for t in _divisors(Ho)
             if t == Ho or ((t * 2 * W) % 128 == 0 and (t * Wo) % 128 == 0)]
    pref = [t for t in cands if t * 2 * W <= max_pool_lanes] or cands
    fit = [t for t in pref if t * row_bytes <= target_bytes]
    tro = max(fit) if fit else min(pref)

    nb = 1
    if tro == Ho:
        fit_nb = [d for d in _divisors(N) if d * Ho * row_bytes <= target_bytes]
        nb = max(fit_nb) if fit_nb else 1
    # Keep >= 2 grid steps when possible (megacore / v7x dual TensorCores).
    while nb > 1 and (N // nb) * (Ho // tro) < 2:
        nb = max(d for d in _divisors(N) if d < nb)
    return nb, tro


def _f32_tile_bytes(rows, cols):
    """f32 bytes of a (rows, cols) buffer padded to (8, 128) VMEM tiles."""
    return (-(-rows // 8) * 8) * (-(-cols // 128) * 128) * 4


def _vmem_limit_bytes(nb, tro, Cin, Cout, W):
    Wo = W // 2
    s_in, s_out = tro * 2 * W, tro * Wo
    per_step = (nb * _f32_tile_bytes(Cin, s_in)
                + nb * _f32_tile_bytes(Cout, s_out)
                + 2 * _f32_tile_bytes(Cin, 1)
                + _f32_tile_bytes(s_in, s_out)
                + _f32_tile_bytes(Cout, Cin))
    need = 2 * per_step + (2 << 20)        # double-buffered pipeline + slack
    # Floor keeps headroom vs. small defaults (v5e: 16 MiB scoped default);
    # cap stays safely under v7x's 64 MiB physical VMEM.
    return int(min(56 << 20, max(24 << 20, need)))


# ----------------------------------------------------------------------------
# Wrapper
# ----------------------------------------------------------------------------
def transition_forward(x_nchw, gamma, beta, running_mean, running_var,
                       conv_weight, eps=1e-5, target_block_bytes=8 << 20):
    """x_nchw: (N, Cin, H, W) -> (N, Cout, H//2, W//2), NCHW throughout.

    BatchNorm uses inference (running-stats) semantics.
    """
    N, Cin, H, W = x_nchw.shape
    Cout = conv_weight.shape[0]
    assert H % 2 == 0 and W % 2 == 0, "2x2 avg_pool here assumes even H and W"
    assert conv_weight.shape[1:] == (Cin, 1, 1), "expected a bias-free 1x1 conv"
    Ho, Wo = H // 2, W // 2

    # Fold BN (running stats) into a per-channel scale/shift.
    scale = (gamma / jnp.sqrt(running_var + eps)).astype(jnp.float32).reshape(Cin, 1)
    shift = (beta.astype(jnp.float32).reshape(Cin, 1)
             - running_mean.astype(jnp.float32).reshape(Cin, 1) * scale)
    w_mat = conv_weight.reshape(Cout, Cin).astype(jnp.float32)

    nb, tro = _pick_blocks(N, Cin, H, W, target_block_bytes)
    s_in, s_out = tro * 2 * W, tro * Wo
    pool_mat = _build_pool_matrix(W, tro)

    # FREE re-views of NCHW (contiguous dims only, no transposes).
    x_flat = x_nchw.reshape(N, Cin, H * W)
    grid = (N // nb, Ho // tro)

    out_flat = pl.pallas_call(
        transition_kernel,
        out_shape=jax.ShapeDtypeStruct((N, Cout, Ho * Wo), x_nchw.dtype),
        grid=grid,
        in_specs=[
            pl.BlockSpec((nb, Cin, s_in), lambda n, r: (n, 0, r)),   # x (lane-dense)
            pl.BlockSpec((Cin, 1), lambda n, r: (0, 0)),             # BN scale
            pl.BlockSpec((Cin, 1), lambda n, r: (0, 0)),             # BN shift
            pl.BlockSpec((s_in, s_out), lambda n, r: (0, 0)),        # pool matrix
            pl.BlockSpec((Cout, Cin), lambda n, r: (0, 0)),          # conv weight
        ],
        out_specs=pl.BlockSpec((nb, Cout, s_out), lambda n, r: (n, 0, r)),
        compiler_params=pltpu.CompilerParams(
            dimension_semantics=("parallel", "parallel"),
            vmem_limit_bytes=_vmem_limit_bytes(nb, tro, Cin, Cout, W)),
    )(x_flat, scale, shift, pool_mat, w_mat)

    # Free reshape back to NCHW.
    return out_flat.reshape(N, Cout, Ho, Wo)


# ----------------------------------------------------------------------------
# Plain-JAX reference (identical inference-BN semantics)
# ----------------------------------------------------------------------------
def transition_reference(x_nchw, gamma, beta, running_mean, running_var,
                         conv_weight, eps=1e-5):
    scale = gamma / jnp.sqrt(running_var + eps)
    shift = beta - running_mean * scale
    y = x_nchw * scale[None, :, None, None] + shift[None, :, None, None]
    y = jnp.maximum(y, 0.0)
    y = jnp.einsum('nchw,oc->nohw', y, conv_weight.reshape(conv_weight.shape[0], -1))
    N, Co, H, W = y.shape
    return y.reshape(N, Co, H // 2, 2, W // 2, 2).mean(axis=(3, 5))


if __name__ == "__main__":
    key = jax.random.PRNGKey(0)
    N, Cin, H, W = 2, 4, 16, 16
    Cout = 8

    k = jax.random.split(key, 6)
    x = jax.random.normal(k[0], (N, Cin, H, W), jnp.float32)
    gamma = jax.random.normal(k[1], (Cin,), jnp.float32) * 0.1 + 1.0
    beta = jax.random.normal(k[2], (Cin,), jnp.float32) * 0.1
    running_mean = jax.random.normal(k[3], (Cin,), jnp.float32) * 0.1
    running_var = jax.random.uniform(k[4], (Cin,), jnp.float32, 0.5, 1.5)
    conv_w = jax.random.normal(k[5], (Cout, Cin, 1, 1), jnp.float32) * 0.2

    out = transition_forward(x, gamma, beta, running_mean, running_var, conv_w)
    out = jax.block_until_ready(out)

    ref = transition_reference(x, gamma, beta, running_mean, running_var, conv_w)
    assert out.shape == (N, Cout, H // 2, W // 2), out.shape
    np.testing.assert_allclose(np.asarray(out), np.asarray(ref), rtol=1e-5, atol=1e-5)

    print("KERNEL_OK")
</pallas_src>

<mosaic_0001>
module attributes {stable_mosaic.version = 11 : i64} {
  func.func @transition_kernel(%arg0: i32, %arg1: i32, %arg2: memref<1x4x256xf32, #tpu.memory_space<vmem>>, %arg3: memref<4x1xf32, #tpu.memory_space<vmem>>, %arg4: memref<4x1xf32, #tpu.memory_space<vmem>>, %arg5: memref<256x64xf32, #tpu.memory_space<vmem>>, %arg6: memref<8x4xf32, #tpu.memory_space<vmem>>, %arg7: memref<1x8x64xf32, #tpu.memory_space<vmem>>) attributes {dimension_semantics = [#tpu.dimension_semantics<parallel>, #tpu.dimension_semantics<parallel>], iteration_bounds = array<i64: 2, 1>, scalar_prefetch = 0 : i64, scratch_operands = 0 : i64, tpu.core_type = #tpu.core_type<tc>, window_params = [{transform_indices = @transform_0, window_bounds = array<i64: 1, 4, 256>}, {pipeline_mode = #tpu.pipeline_mode<synchronous>, transform_indices = @transform_1, window_bounds = array<i64: 4, 1>}, {pipeline_mode = #tpu.pipeline_mode<synchronous>, transform_indices = @transform_2, window_bounds = array<i64: 4, 1>}, {pipeline_mode = #tpu.pipeline_mode<synchronous>, transform_indices = @transform_3, window_bounds = array<i64: 256, 64>}, {pipeline_mode = #tpu.pipeline_mode<synchronous>, transform_indices = @transform_4, window_bounds = array<i64: 8, 4>}, {transform_indices = @transform_5, window_bounds = array<i64: 1, 8, 64>}]} {
    %c0 = arith.constant 0 : index
    %c0_0 = arith.constant 0 : index
    %0 = vector.load %arg3[%c0, %c0_0] : memref<4x1xf32, #tpu.memory_space<vmem>>, vector<4x1xf32>
    %c0_1 = arith.constant 0 : index
    %c0_2 = arith.constant 0 : index
    %1 = vector.load %arg4[%c0_1, %c0_2] : memref<4x1xf32, #tpu.memory_space<vmem>>, vector<4x1xf32>
    %c0_3 = arith.constant 0 : index
    %c0_4 = arith.constant 0 : index
    %2 = vector.load %arg5[%c0_3, %c0_4] : memref<256x64xf32, #tpu.memory_space<vmem>>, vector<256x64xf32>
    %c0_5 = arith.constant 0 : index
    %c0_6 = arith.constant 0 : index
    %3 = vector.load %arg6[%c0_5, %c0_6] : memref<8x4xf32, #tpu.memory_space<vmem>>, vector<8x4xf32>
    %c0_7 = arith.constant 0 : index
    %c0_8 = arith.constant 0 : index
    %c0_9 = arith.constant 0 : index
    %4 = vector.load %arg2[%c0_7, %c0_8, %c0_9] : memref<1x4x256xf32, #tpu.memory_space<vmem>>, vector<1x4x256xf32>
    %5 = vector.shape_cast %4 : vector<1x4x256xf32> to vector<4x256xf32>
    %6 = vector.broadcast %0 : vector<4x1xf32> to vector<4x256xf32>
    %7 = arith.mulf %5, %6 : vector<4x256xf32>
    %8 = vector.broadcast %1 : vector<4x1xf32> to vector<4x256xf32>
    %9 = arith.addf %7, %8 : vector<4x256xf32>
    %cst = arith.constant 0.000000e+00 : f32
    %10 = vector.broadcast %cst : f32 to vector<4x256xf32>
    %11 = arith.maximumf %9, %10 : vector<4x256xf32>
    %cst_10 = arith.constant dense<0.000000e+00> : vector<4x64xf32>
    %12 = tpu.matmul %11, %2, %cst_10 {dimension_numbers = #tpu.dot_dimension_numbers<[1], [0], [0], [1], [0, 0, 1, 1], [], []>} : vector<4x256xf32>, vector<256x64xf32>, vector<4x64xf32> -> vector<4x64xf32>
    %cst_11 = arith.constant dense<0.000000e+00> : vector<8x64xf32>
    %13 = tpu.matmul %3, %12, %cst_11 {dimension_numbers = #tpu.dot_dimension_numbers<[1], [0], [0], [1], [0, 0, 1, 1], [], []>} : vector<8x4xf32>, vector<4x64xf32>, vector<8x64xf32> -> vector<8x64xf32>
    %c0_12 = arith.constant 0 : index
    %c0_13 = arith.constant 0 : index
    %c0_14 = arith.constant 0 : index
    %14 = vector.load %arg7[%c0_12, %c0_13, %c0_14] : memref<1x8x64xf32, #tpu.memory_space<vmem>>, vector<1x8x64xf32>
    %15 = vector.shape_cast %14 : vector<1x8x64xf32> to vector<8x64xf32>
    %16 = vector.shape_cast %13 : vector<8x64xf32> to vector<1x8x64xf32>
    tpu.vector_store %arg7[%c0_12, %c0_13, %c0_14], %16 {strides = array<i32>} : memref<1x8x64xf32, #tpu.memory_space<vmem>>, vector<1x8x64xf32>,
    return
  }
  func.func @transform_0(%arg0: i32, %arg1: i32) -> (i32, i32, i32) {
    %c0_i32 = arith.constant 0 : i32
    %c0_i32_0 = arith.constant 0 : i32
    return %arg0, %c0_i32, %arg1 : i32, i32, i32
  }
  func.func @transform_1(%arg0: i32, %arg1: i32) -> (i32, i32) {
    %c0_i32 = arith.constant 0 : i32
    %c0_i32_0 = arith.constant 0 : i32
    %c0_i32_1 = arith.constant 0 : i32
    return %c0_i32, %c0_i32_0 : i32, i32
  }
  func.func @transform_2(%arg0: i32, %arg1: i32) -> (i32, i32) {
    %c0_i32 = arith.constant 0 : i32
    %c0_i32_0 = arith.constant 0 : i32
    %c0_i32_1 = arith.constant 0 : i32
    return %c0_i32, %c0_i32_0 : i32, i32
  }
  func.func @transform_3(%arg0: i32, %arg1: i32) -> (i32, i32) {
    %c0_i32 = arith.constant 0 : i32
    %c0_i32_0 = arith.constant 0 : i32
    %c0_i32_1 = arith.constant 0 : i32
    return %c0_i32, %c0_i32_0 : i32, i32
  }
  func.func @transform_4(%arg0: i32, %arg1: i32) -> (i32, i32) {
    %c0_i32 = arith.constant 0 : i32
    %c0_i32_0 = arith.constant 0 : i32
    %c0_i32_1 = arith.constant 0 : i32
    return %c0_i32, %c0_i32_0 : i32, i32
  }
  func.func @transform_5(%arg0: i32, %arg1: i32) -> (i32, i32, i32) {
    %c0_i32 = arith.constant 0 : i32
    %c0_i32_0 = arith.constant 0 : i32
    return %arg0, %c0_i32, %arg1 : i32, i32, i32
  }
}

</mosaic_0001>

<bundles_post_ra>
// kernel: tpu_custom_call.1
= control target key start
LH: loop header
LB: loop body
LE: loop exit
PB: predicated region body
PF: predicated region fallthrough
CT: control target
= control target key end

     0   :  { %10 = vsyncpa [#allocation3], 0  ;;  %s1039_s0 = inlined_call_operand.vmem [shape: f32[2,4,256], index: 0, kind: input, shape index: {}]   ;;  %s1040_s1 = inlined_call_operand.vmem [shape: f32[4,1], index: 1, kind: input, shape index: {}]   ;;  %s1041_s2 = inlined_call_operand.vmem [shape: f32[4,1], index: 2, kind: input, shape index: {}]   ;;  %s1042_s3 = inlined_call_operand.vmem [shape: f32[256,64], index: 3, kind: input, shape index: {}]   ;;  %s1043_s4 = inlined_call_operand.vmem [shape: f32[8,4], index: 4, kind: input, shape index: {}]   ;;  %s1044_s5 = inlined_call_operand.hbm [shape: f32[2,8,64], index: 5, kind: output, shape index: {}]  }
   0x1   :  { %12 = vsyncpa [#allocation3 + $0x1], 0  ;;  %s822_s18 = smov 0   ;;  %s824_s19 = smov 0  }
   0x2   :  { %s826_s20 = smov 0   ;;  %s828_s21 = smov 0  }
   0x3   :  { %s830_s22 = smov 0   ;;  %s832_s23 = smov 0  }
   0x4 LB: > { %s558_s24 = sadd.s32 4294967295, %s785_s23   ;;  %s559_s25 = sadd.s32 4294967294, %s785_s23   ;;  %s785_s23 = sphi %s832_s23, %s18_s23   ;;  %s781_s22 = sphi %s830_s22, %s1051_s22   ;;  %s777_s21 = sphi %s828_s21, %s1050_s21   ;;  %s773_s20 = sphi %s826_s20, %s1049_s20   ;;  %s769_s19 = sphi %s824_s19, %s1048_s19   ;;  %s765_s18 = sphi %s822_s18, %s1047_s18  }
   0x5   : > { %s30_s26 = sadd.s32 1, %s781_s22  ;;  %s151_s27 = sadd.s32 1, %s773_s20 }
   0x6   : > { %p32_p0 = scmp.ge.s32.totalorder %s30_s26, 2  ;;  %p161_p1 = scmp.ne.s32.totalorder %s773_s20, %s769_s19 }
   0x7   : > { %p162_p2 = scmp.eq.s32.totalorder %s558_s24, 1  ;;  %p167_p3 = scmp.ne.s32.totalorder %s769_s19, %s765_s18 }
   0x8   : > { %s1053_s26 = smov (%p32_p0, %s30_s26), 0  ;;  %p168_p5 = scmp.eq.s32.totalorder %s559_s25, 1 }
   0x9   : > { %p862_p4 = por %p162_p2, %p161_p1  ;;  %s146_s29 = ssub.s32 %s781_s22, %s1053_s26 }
   0xa   : > { %p562_p6 = scmp.ge.s32.totalorder %s785_s23, 1  ;;  %p149_p7 = scmp.eq.s32.totalorder %s146_s29, 0 }
   0xb   : > { %p869_p8 = por %p168_p5, %p167_p3  ;;  %p211_p9 = scmp.lt.s32.totalorder %s785_s23, 3 }
   0xc   : > { %s875_s6 = scalar_select %p149_p7, %s773_s20, %s151_s27  }
   0xd   : > { %p212_p10 = pnand %p562_p6, %p211_p9 }
   0xe   : > { %v253_v0 = vld [vmem:[%s1040_s1] sm:$0xf] (!%p212_p10)  ;;  %v787_v2 = vmov (!%p212_p10), 0   ;;  %v272_v4 = vld [vmem:[%s1042_s3 + $0x88] sm:$0xff] (!%p212_p10)  ;;  %v273_v9 = vld [vmem:[%s1042_s3 + $0x90] sm:$0xff] (!%p212_p10)  ;;  %p244_p11 = scmp.lt.s32.totalorder (!%p212_p10), %s777_s21, 1  ;;  %v296_v53 = vlaneseq (!%p212_p10) }
   0xf   : > { %215 = sbr.rel (%p212_p10) target bundleno = 599 (0x257), region = 40  ;;  %v271_v1 = vld [vmem:[%s1042_s3 + $0x80] sm:$0xff] (!%p212_p10)  ;;  %706 = vset.pattern.permute.xlu0 (!%p212_p10), %v787_v2  ;;  %v256_v6 = vld [vmem:[%s1042_s3 + $0x8] sm:$0xff] (!%p212_p10)  ;;  %v274_v10 = vld [vmem:[%s1042_s3 + $0x98] sm:$0xff] (!%p212_p10)  ;;  %v788_v51 = vmov (!%p212_p10), 839922192  }
  0x10   : > { %v254_v3 = vld [vmem:[%s1041_s2] sm:$0xf] (!%p212_p10)  ;;  %291 = vperm.xlu0 (!%p212_p10), %706, %v253_v0   ;;  %v615_v7 = vpack.c.bf16 (!%p212_p10), %v272_v4, %v271_v1  ;;  %v257_v11 = vld [vmem:[%s1042_s3 + $0x10] sm:$0xff] (!%p212_p10)  ;;  %v619_v12 = vpack.c.bf16 (!%p212_p10), %v274_v10, %v273_v9  ;;  %v258_v13 = vld [vmem:[%s1042_s3 + $0x18] sm:$0xff] (!%p212_p10)  ;;  %v294_v52 = vunpack.c.l.s4 (!%p212_p10), %v788_v51  ;;  %v297_v55 = vshrl.u32 (!%p212_p10), %v296_v53, 7  ;;  %s240_s7 = sand.u32 (!%p212_p10), 1, %s769_s19  }
  0x11   : > { %v255_v5 = vld [vmem:[%s1042_s3] sm:$0xff] (!%p212_p10)  ;;  %v276_v15 = vld [vmem:[%s1042_s3 + $0xa8] sm:$0xff] (!%p212_p10)  ;;  %v621_v16 = vpack.c.bf16 (!%p212_p10), %v258_v13, %v257_v11  ;;  %v277_v20 = vld [vmem:[%s1042_s3 + $0xb0] sm:$0xff] (!%p212_p10)  ;;  %v789_v2 = vmov (!%p212_p10), 0.0   ;;  %vm790_vm0 = vmmov (!%p212_p10), 0   ;;  %vm393_vm1 = vcmask (!%p212_p10), 1043456  }
  0x12   : > { %v617_v8 = vpack.c.bf16 (!%p212_p10), %v256_v6, %v255_v5  ;;  %v275_v14 = vld [vmem:[%s1042_s3 + $0xa0] sm:$0xff] (!%p212_p10)  ;;  %616 = vmatprep.subr.bf16.mxu0 (!%p212_p10), %v615_v7  ;;  %v260_v19 = vld [vmem:[%s1042_s3 + $0x28] sm:$0xff] (!%p212_p10)  ;;  %v278_v21 = vld [vmem:[%s1042_s3 + $0xb8] sm:$0xff] (!%p212_p10)  ;;  %v295_v54 = vunpack.c.0.s8 (!%p212_p10), %v294_v52  ;;  %610 = vmatprep.subr.mxu1 (!%p212_p10), %v789_v2  ;;  %vm389_vm2 = vcmask (!%p212_p10), 31744   ;;  %s563_s8 = sshll.u32 (!%p212_p10), %s240_s7, 3  ;;  %s569_s9 = sshll.u32 (!%p212_p10), %s777_s21, 7 }
  0x13   : > { %v623_v17 = vpack.c.bf16 (!%p212_p10), %v276_v15, %v275_v14  ;;  %v259_v18 = vld [vmem:[%s1042_s3 + $0x20] sm:$0xff] (!%p212_p10)  ;;  %v627_v23 = vpack.c.bf16 (!%p212_p10), %v278_v21, %v277_v20  ;;  %v261_v24 = vld [vmem:[%s1042_s3 + $0x30] sm:$0xff] (!%p212_p10)  ;;  %v262_v25 = vld [vmem:[%s1042_s3 + $0x38] sm:$0xff] (!%p212_p10)  ;;  %612 = vmatprep.mubr.msk.f32.mxu1 (!%p212_p10), %vm790_vm0, %v789_v2  ;;  %s242_s10 = scalar_lea.vmem (!%p212_p10), [#allocation2], %s563_s8  ;;  %vm467_vm3 = vcmask (!%p212_p10), 523264   ;;  %s992_s14 = scalar_lea.hbm (!%p212_p10), %s1044_s5, %s569_s9 }
  0x14   : > { %618 = vmatpush3.bf16.msra.mxu0 (!%p212_p10), %v617_v8  ;;  %304 = vperm.xlu0 (!%p212_p10), %706, %v254_v3   ;;  %v625_v22 = vpack.c.bf16 (!%p212_p10), %v260_v19, %v259_v18  ;;  %v279_v26 = vld [vmem:[%s1042_s3 + $0xc0] sm:$0xff] (!%p212_p10)  ;;  %v280_v27 = vld [vmem:[%s1042_s3 + $0xc8] sm:$0xff] (!%p212_p10)  ;;  %v629_v28 = vpack.c.bf16 (!%p212_p10), %v262_v25, %v261_v24  ;;  %v281_v32 = vld [vmem:[%s1042_s3 + $0xd0] sm:$0xff] (!%p212_p10)  ;;  %v298_v56 = vsub.s32 (!%p212_p10), %v295_v54, %v297_v55  ;;  %s484_s11 = sshll.u32 (!%p212_p10), %s242_s10, 4  ;;  %s994_s11 = int_to_ptr.vmem [resolvable:$true] %s484_s11 }
  0x15   : > { %620 = vmatprep.subr.bf16.mxu0 (!%p212_p10), %v619_v12  ;;  %v631_v29 = vpack.c.bf16 (!%p212_p10), %v280_v27, %v279_v26  ;;  %v263_v30 = vld [vmem:[%s1042_s3 + $0x40] sm:$0xff] (!%p212_p10)  ;;  %v264_v31 = vld [vmem:[%s1042_s3 + $0x48] sm:$0xff] (!%p212_p10)  ;;  %v282_v33 = vld [vmem:[%s1042_s3 + $0xd8] sm:$0xff] (!%p212_p10) }
  0x16   : > { %v633_v34 = vpack.c.bf16 %v264_v31, %v263_v30  ;;  %v635_v35 = vpack.c.bf16 %v282_v33, %v281_v32  ;;  %v265_v36 = vld [vmem:[%s1042_s3 + $0x50] sm:$0xff]  ;;  %v266_v37 = vld [vmem:[%s1042_s3 + $0x58] sm:$0xff]  ;;  %v283_v38 = vld [vmem:[%s1042_s3 + $0xe0] sm:$0xff]  ;;  %s245_s15 = scalar_select %p244_p11, %s777_s21, 1 }
  0x17   : > { %v284_v39 = vld [vmem:[%s1042_s3 + $0xe8] sm:$0xff]  ;;  %v637_v40 = vpack.c.bf16 %v266_v37, %v265_v36  ;;  %v267_v42 = vld [vmem:[%s1042_s3 + $0x60] sm:$0xff]  ;;  %v285_v44 = vld [vmem:[%s1042_s3 + $0xf0] sm:$0xff]  ;;  %s791_s21 = smov [#allocation2]  }
  0x18   : > { %622 = vmatpush3.bf16.msra.mxu0 %v621_v16  ;;  %v639_v41 = vpack.c.bf16 %v284_v39, %v283_v38  ;;  %v268_v43 = vld [vmem:[%s1042_s3 + $0x68] sm:$0xff]  ;;  %v286_v45 = vld [vmem:[%s1042_s3 + $0xf8] sm:$0xff]  ;;  %v269_v48 = vld [vmem:[%s1042_s3 + $0x70] sm:$0xff]  ;;  %s572_s16 = sshll.u32 %s245_s15, 3  ;;  %s470_s15 = scalar_lea.sflag [#allocation3], %s240_s7 }
  0x19   : > { %624 = vmatprep.subr.bf16.mxu0 %v623_v17  ;;  %v641_v46 = vpack.c.bf16 %v268_v43, %v267_v42  ;;  %v643_v47 = vpack.c.bf16 %v286_v45, %v285_v44  ;;  %v270_v49 = vld [vmem:[%s1042_s3 + $0x78] sm:$0xff]  ;;  %s251_s25 = scalar_lea.vmem %s1039_s0, %s572_s16  ;;  %v287_v6 = vld [vmem:[%s1043_s4] sm:$0xff]  ;;  %s707_s16 = scalar_lea.vmem %s994_s11, 128 }
  0x1a   : > { %v645_v50 = vpack.c.bf16 %v270_v49, %v269_v48  ;;  %v288_v59 = vld [vmem:[%s251_s25] sm:$0xff]  ;;  %p708_p12 = scmp.ne.s32.totalorder %s994_s11, %s707_s16  ;;  %s711_s17 = sshll.u32 %s791_s21, 4  ;;  %s712_s17 = int_to_ptr.vmem [resolvable:$false] %s711_s17 }
  0x1b   : > { %s713_s24 = scalar_lea.vmem %s712_s17, 256  ;;  %p714_p1 = scmp.lt.s32.totalorder %s994_s11, %s712_s17 }
  0x1c   : > { %626 = vmatpush3.bf16.msra.mxu0 %v625_v22  ;;  %p709_p13 = pnand %p708_p12, %p862_p4  ;;  %p715_p2 = scmp.lt.s32.totalorder %s713_s24, %s707_s16 }
  0x1d   : > { %628 = vmatprep.subr.bf16.mxu0 %v627_v23 }
  0x1e   : > { %p710_p0 = pneg %p709_p13  ;;  %p716_p3 = por %p715_p2, %p714_p1 }
  0x20   : > { %630 = vmatpush3.bf16.msra.mxu0 %v629_v28  ;;  %p717_p5 = pnand %p716_p3, %p710_p0 }
  0x21   : > { %632 = vmatprep.subr.bf16.mxu0 %v631_v29 }
  0x24   : > { %634 = vmatpush3.bf16.msra.mxu0 %v633_v34 }
  0x25   : > { %636 = vmatprep.subr.bf16.mxu0 %v635_v35 }
  0x28   : > { %638 = vmatpush3.bf16.msra.mxu0 %v637_v40 }
  0x29   : > { %640 = vmatprep.subr.bf16.mxu0 %v639_v41 }
  0x2c   : > { %642 = vmatpush3.bf16.msra.mxu0 %v641_v46 }
  0x2d   : > { %644 = vmatprep.subr.bf16.mxu0 %v643_v47 }
  0x30   : > { %646 = vmatpush3.bf16.msra.mxu0 %v645_v50 }
  0x8f   : > { %v292_v57 = vpop.permute.xlu0 %291 }
  0x90   : > { %v299_v58 = vrot.slane %v292_v57, %v298_v56 }
  0x92   : > { %v301_v61 = vmul.f32 %v299_v58, %v288_v59 }
  0x93   : > { %v305_v60 = vpop.permute.xlu0 %304 }
  0x94   : > { %v312_v62 = vrot.slane %v305_v60, %v298_v56 }
  0x96   : > { %v314_v63 = vadd.f32 %v312_v62, %v301_v61 }
  0x98   : > { %v315_v0 = vmax.f32 %v314_v63, 0.0 }
  0x9a   : > { %v317_v1 = vcombine.high %v315_v0, %v315_v0 }
  0x9c   : > { %383 = vmatprep.mubr.f32.mxu0 %v317_v1 }
  0x9d   : > { %384 = vmatmul.mubr.f32.vlgmr.msra.gmra.mrb[0].mxu0 %v315_v0 }
 0x170   : > { %v605_v3 = vpop.f32.mrb[0].mxu0 }
 0x171   : > { %v606_v4 = vpop.f32.mrb[1].mxu0 }
 0x172   : > { %v607_v5 = vadd.f32 %v606_v4, %v605_v3 }
 0x174   : > { %611 = vmatpush3.msk.msra.mxu1 %vm393_vm1, %v607_v5 }
 0x175   : > { %613 = vmatmul.mubr.msk.f32.vlgmr.msra.gmra.mrb[0].mxu1 %vm389_vm2, %v287_v6 }
 0x248   : > { %v463_v7 = vpop.f32.mrb[0].mxu1 }
 0x249   : > { %468 = vst.msk [vmem:[%s242_s10] sm:$0xff] %vm467_vm3, %v463_v7  ;;  %v614_v8 = vpop.f32.mrb[1].mxu1 }
 0x24a   : > { %720 = shalt.err (!%p717_p5)
}
 0x24b   : > { %s721_s25 = scalar_lea.hbm %s992_s14, 128  ;;  %s725_s7 = scalar_lea.hbm %s1044_s5, 256 }
 0x24c   : > { %p722_p6 = scmp.ne.s32.totalorder %s992_s14, %s721_s25  ;;  %p726_p10 = scmp.lt.u32.totalorder %s992_s14, %s1044_s5 }
 0x24d   : > { %p727_p11 = scmp.lt.u32.totalorder %s725_s7, %s721_s25  ;;  %p729_p13 = scmp.lt.u32.totalorder %s721_s25, %s992_s14 }
 0x24e   : > { %p723_p7 = pnand %p722_p6, %p862_p4 }
 0x24f   : > { %p728_p12 = por %p727_p11, %p726_p10 }
 0x250   : > { %p724_p9 = pneg %p723_p7 }
 0x251   : > { %p730_p0 = por %p729_p13, %p728_p12 }
 0x253   : > { %p731_p1 = pnand %p730_p0, %p724_p9 }
 0x255   : > { %734 = shalt.err (!%p731_p1)
}
 0x256   : > { %647 = dma.vmem_to_hbm [thread:$0]  (%p862_p4), %s994_s11, 128, %s992_s14, %s470_s15  }
 0x257 PF: > { %p653_p2 = scmp.ge.s32.totalorder %s785_s23, 2  ;;  %s496_s10 = sand.u32 1, %s765_s18  }
 0x258   : > { %s497_s12 = scalar_lea.sflag [#allocation3], %s496_s10 }
 0x259   : > { %p650_p3 = pnand %p653_p2, %p869_p8 }
 0x25b   : > { %760 = dma.done.wait (!%p650_p3), %s497_s12, 128  }
 0x25c   : > { %762 = vsyncadd (!%p650_p3), %s497_s12, 4294967168  ;;  %s18_s23 = sadd.s32 1, %s785_s23   ;;  %s1047_s18 = smov %s769_s19 }
 0x25d   : > { %p15_p5 = scmp.ge.s32.totalorder %s18_s23, 4   ;;  %s1048_s19 = smov %s773_s20 }
 0x25e   : > { %s1049_s20 = smov %s875_s6  ;;  %s1050_s21 = smov %s781_s22 }
 0x25f   : > { %s1051_s22 = smov %s1053_s26  ;;  %17 = sbr.rel (!%p15_p5) target bundleno = 4 (0x4), region = 75 }
 0x266   :  { %502 = vsyncpa [#allocation3], 1 }
 0x267   :  { %504 = vsyncpa [#allocation3 + $0x1], 1 }

</bundles_post_ra>
